<compile_context>
chip_gen: v6e
topology: v6e:2x2x1
jax: 0.10.0
libtpu: 0.0.40
codegen_flags: <defaults>
</compile_context>

<pallas_src>
import functools

import jax
import jax.numpy as jnp
from jax import lax
from jax.experimental import pallas as pl
from jax.experimental.pallas import tpu as pltpu


DENSE_PAD = 8        # pad dense feature columns to a small aligned width
MAX_TILE_B = 1024    # per-step batch tile (amortizes grid overhead, fits all gens)


def _round_up(x, m):
    return (x + m - 1) // m * m


# ----------------------------- Pallas kernel --------------------------------
def dnnfm_fused_kernel(ids_ref, dense_ref, embg_ref, w1s_ref, w1d_ref,
                       b1_ref, w2_ref, b2_ref, o_ref, *, vocab):
    """Fused embedding gather + concat + 2-layer relu MLP for one batch tile."""
    tile_b, num_sparse = ids_ref.shape
    sv = embg_ref.shape[0]                      # num_sparse * vocab

    # ---- flattened one-hot over all sparse features: (TILE_B, S*V) -----------
    ids = ids_ref[...]                                             # (TILE_B, S) int32
    col = lax.broadcasted_iota(jnp.int32, (tile_b, sv), 1)
    oh = None
    for s in range(num_sparse):
        band = col == (ids[:, s:s + 1] + s * vocab)                # disjoint bands
        oh = band if oh is None else jnp.logical_or(oh, band)
    onehot = jnp.where(oh, 1.0, 0.0).astype(jnp.bfloat16)          # (TILE_B, S*V)

    # ---- gather + concat of all sparse embeddings as one exact MXU pass ------
    sparse_x = jnp.dot(onehot, embg_ref[...],
                       preferred_element_type=jnp.float32)         # (TILE_B, S*E)

    # ---- layer 1: split-K matmul (sparse block + dense block), bias, relu ----
    h1 = jnp.dot(sparse_x.astype(jnp.bfloat16), w1s_ref[...],
                 preferred_element_type=jnp.float32)
    h1 = h1 + jnp.dot(dense_ref[...], w1d_ref[...],
                      preferred_element_type=jnp.float32)
    h1 = jnp.maximum(h1 + b1_ref[...], 0.0)                        # (TILE_B, H1) f32

    # ---- layer 2: matmul, bias, relu ------------------------------------------
    h2 = jnp.dot(h1.astype(jnp.bfloat16), w2_ref[...],
                 preferred_element_type=jnp.float32)
    o_ref[...] = jnp.maximum(h2 + b2_ref[...], 0.0).astype(o_ref.dtype)
    # TODO(synk): fuse the downstream DeepFM logits head here when available so the
    # written slab is lane-dense (H2=64 < 128 lanes -> masked stores today).


# ------------------------------- wrapper -------------------------------------
@functools.partial(jax.jit,
                   static_argnames=("num_sparse", "vocab", "emb_dim", "dense_dims"))
def dnnfm_forward(X, params, *, num_sparse, vocab, emb_dim, dense_dims):
    B = X.shape[0]
    S, V, E = num_sparse, vocab, emb_dim
    dense_dim = sum(dense_dims)
    w1, b1, w2, b2 = params["w1"], params["b1"], params["w2"], params["b2"]
    H1, H2 = w1.shape[1], w2.shape[1]

    # --- split the raw input matrix (same column layout as the torch module) ---
    ids = X[:, :S].astype(jnp.int32)                               # (B, S)
    dense = X[:, S:S + dense_dim]                                  # (B, dense_dim)
    dense_p = jnp.zeros((B, DENSE_PAD), jnp.float32).at[:, :dense_dim].set(dense)
    dense_p = dense_p.astype(jnp.bfloat16)

    # --- block-diagonal stacked embedding table: (S*V, S*E), bf16 --------------
    embg = jnp.zeros((S * V, S * E), jnp.float32)
    for i in range(S):
        embg = embg.at[i * V:(i + 1) * V, i * E:(i + 1) * E].set(params["emb"][i])
    embg = embg.astype(jnp.bfloat16)

    # --- split / pad W1 so the kernel needs no in-kernel concat ----------------
    w1s = w1[:S * E, :].astype(jnp.bfloat16)                       # (S*E, H1)
    w1d = jnp.zeros((DENSE_PAD, H1), jnp.float32).at[:dense_dim, :].set(w1[S * E:, :])
    w1d = w1d.astype(jnp.bfloat16)
    w2b = w2.astype(jnp.bfloat16)
    b1r = b1.reshape(1, H1).astype(jnp.float32)
    b2r = b2.reshape(1, H2).astype(jnp.float32)

    # --- batch tiling -----------------------------------------------------------
    tile_b = min(MAX_TILE_B, _round_up(B, 8))
    b_pad = _round_up(B, tile_b)
    if b_pad != B:
        ids = jnp.pad(ids, ((0, b_pad - B), (0, 0)))
        dense_p = jnp.pad(dense_p, ((0, b_pad - B), (0, 0)))
    grid = (b_pad // tile_b,)

    flops = 2 * b_pad * (S * V * S * E + S * E * H1 + DENSE_PAD * H1 + H1 * H2)
    bytes_accessed = (ids.size * 4 + dense_p.size * 2 + b_pad * H2 * 4
                      + (embg.size + w1s.size + w1d.size + w2b.size) * 2
                      + (b1r.size + b2r.size) * 4)

    kernel = functools.partial(dnnfm_fused_kernel, vocab=V)
    out = pl.pallas_call(
        kernel,
        out_shape=jax.ShapeDtypeStruct((b_pad, H2), jnp.float32),
        grid=grid,
        in_specs=[
            pl.BlockSpec((tile_b, S), lambda i: (i, 0)),           # ids (streamed)
            pl.BlockSpec((tile_b, DENSE_PAD), lambda i: (i, 0)),   # dense (streamed)
            pl.BlockSpec((S * V, S * E), lambda i: (0, 0)),        # embeddings (resident)
            pl.BlockSpec((S * E, H1), lambda i: (0, 0)),           # W1 sparse rows
            pl.BlockSpec((DENSE_PAD, H1), lambda i: (0, 0)),       # W1 dense rows
            pl.BlockSpec((1, H1), lambda i: (0, 0)),               # b1
            pl.BlockSpec((H1, H2), lambda i: (0, 0)),              # W2
            pl.BlockSpec((1, H2), lambda i: (0, 0)),               # b2
        ],
        out_specs=pl.BlockSpec((tile_b, H2), lambda i: (i, 0)),
        compiler_params=pltpu.CompilerParams(
            dimension_semantics=("parallel",)),
        cost_estimate=pl.CostEstimate(flops=flops, transcendentals=0,
                                      bytes_accessed=bytes_accessed),
    )(ids, dense_p, embg, w1s, w1d, b1r, w2b, b2r)
    return out[:B]


# ------------------------------- references ----------------------------------
def _ref_bf16(ids, dense, emb_tables, w1, b1, w2, b2):
    """Matches the kernel's numerics (bf16 operands, f32 accumulation, split K)."""
    S = ids.shape[1]
    E = emb_tables[0].shape[1]
    sp = jnp.concatenate(
        [jnp.take(emb_tables[i].astype(jnp.bfloat16), ids[:, i], axis=0)
         for i in range(S)], axis=-1)
    h1 = (jnp.dot(sp, w1[:S * E].astype(jnp.bfloat16),
                  preferred_element_type=jnp.float32)
          + jnp.dot(dense.astype(jnp.bfloat16), w1[S * E:].astype(jnp.bfloat16),
                    preferred_element_type=jnp.float32) + b1)
    h1 = jnp.maximum(h1, 0.0)
    h2 = jnp.dot(h1.astype(jnp.bfloat16), w2.astype(jnp.bfloat16),
                 preferred_element_type=jnp.float32) + b2
    return jnp.maximum(h2, 0.0)


def _ref_f32(ids, dense, emb_tables, w1, b1, w2, b2):
    """Faithful f32 reference of the torch module's forward."""
    S = ids.shape[1]
    sp = jnp.concatenate([jnp.take(emb_tables[i], ids[:, i], axis=0)
                          for i in range(S)], axis=-1)
    x = jnp.concatenate([sp, dense], axis=-1)
    h1 = jnp.maximum(x @ w1 + b1, 0.0)
    return jnp.maximum(h1 @ w2 + b2, 0.0)


# --------------------------------- main ---------------------------------------
if __name__ == "__main__":
    key = jax.random.PRNGKey(0)

    B = 8                   # batch
    num_sparse = 4          # SparseFeat count
    vocab = 10
    emb_dim = 8
    dense_dims = (1, 1)     # two DenseFeat of dimension 1
    D_in = num_sparse * emb_dim + sum(dense_dims)   # compute_input_dim = 34
    H1, H2 = 256, 64        # dnn_hidden_units default
    init_std = 1e-4

    keys = jax.random.split(key, num_sparse + 4)
    emb_tables = [init_std * jax.random.normal(keys[i], (vocab, emb_dim), jnp.float32)
                  for i in range(num_sparse)]
    w1 = init_std * jax.random.normal(keys[num_sparse + 0], (D_in, H1), jnp.float32)
    b1 = jnp.zeros((H1,), jnp.float32)
    w2 = init_std * jax.random.normal(keys[num_sparse + 1], (H1, H2), jnp.float32)
    b2 = jnp.zeros((H2,), jnp.float32)
    params = {"emb": emb_tables, "w1": w1, "b1": b1, "w2": w2, "b2": b2}

    sparse_ids = jax.random.randint(keys[num_sparse + 2], (B, num_sparse), 0, vocab)
    dense_vals = jax.random.normal(keys[num_sparse + 3], (B, sum(dense_dims)), jnp.float32)
    X = jnp.concatenate([sparse_ids.astype(jnp.float32), dense_vals], axis=-1)

    out = dnnfm_forward(X, params, num_sparse=num_sparse, vocab=vocab,
                        emb_dim=emb_dim, dense_dims=dense_dims)
    out = jax.block_until_ready(out)
    assert out.shape == (B, H2)

    ids_i = sparse_ids.astype(jnp.int32)
    ref_bf = _ref_bf16(ids_i, dense_vals, emb_tables, w1, b1, w2, b2)
    ref_32 = _ref_f32(ids_i, dense_vals, emb_tables, w1, b1, w2, b2)
    assert jnp.allclose(out, ref_bf, rtol=5e-3, atol=1e-7), "mismatch vs bf16-matched ref"
    assert jnp.allclose(out, ref_32, rtol=5e-2, atol=1e-7), "mismatch vs f32 ref"

    # Stronger layout check at larger magnitudes / batch (review feedback).
    k2 = jax.random.split(jax.random.PRNGKey(1), num_sparse + 4)
    scale = 0.05
    emb2 = [scale * jax.random.normal(k2[i], (vocab, emb_dim), jnp.float32)
            for i in range(num_sparse)]
    w1b = scale * jax.random.normal(k2[num_sparse + 0], (D_in, H1), jnp.float32)
    w2c = scale * jax.random.normal(k2[num_sparse + 1], (H1, H2), jnp.float32)
    b1b = scale * jax.random.normal(k2[num_sparse + 2], (H1,), jnp.float32)
    b2b = scale * jax.random.normal(k2[num_sparse + 3], (H2,), jnp.float32)
    params2 = {"emb": emb2, "w1": w1b, "b1": b1b, "w2": w2c, "b2": b2b}
    B2 = 64
    kk = jax.random.split(jax.random.PRNGKey(2), 2)
    ids2 = jax.random.randint(kk[0], (B2, num_sparse), 0, vocab)
    dv2 = jax.random.normal(kk[1], (B2, sum(dense_dims)), jnp.float32)
    X2 = jnp.concatenate([ids2.astype(jnp.float32), dv2], axis=-1)
    out2 = jax.block_until_ready(
        dnnfm_forward(X2, params2, num_sparse=num_sparse, vocab=vocab,
                      emb_dim=emb_dim, dense_dims=dense_dims))
    ref2 = _ref_bf16(ids2.astype(jnp.int32), dv2, emb2, w1b, b1b, w2c, b2b)
    assert out2.shape == (B2, H2)
    assert jnp.allclose(out2, ref2, rtol=2e-2, atol=1e-4), "mismatch at scale 0.05"

    print("KERNEL_OK")
</pallas_src>

<mosaic_0001>
module attributes {stable_mosaic.version = 11 : i64} {
  func.func @dnnfm_fused_kernel(%arg0: i32, %arg1: memref<8x4xi32, #tpu.memory_space<vmem>>, %arg2: memref<8x8xbf16, #tpu.memory_space<vmem>>, %arg3: memref<40x32xbf16, #tpu.memory_space<vmem>>, %arg4: memref<32x256xbf16, #tpu.memory_space<vmem>>, %arg5: memref<8x256xbf16, #tpu.memory_space<vmem>>, %arg6: memref<1x256xf32, #tpu.memory_space<vmem>>, %arg7: memref<256x64xbf16, #tpu.memory_space<vmem>>, %arg8: memref<1x64xf32, #tpu.memory_space<vmem>>, %arg9: memref<8x64xf32, #tpu.memory_space<vmem>>) attributes {dimension_semantics = [#tpu.dimension_semantics<parallel>], iteration_bounds = array<i64: 1>, scalar_prefetch = 0 : i64, scratch_operands = 0 : i64, tpu.core_type = #tpu.core_type<tc>, window_params = [{transform_indices = @transform_0, window_bounds = array<i64: 8, 4>}, {transform_indices = @transform_1, window_bounds = array<i64: 8, 8>}, {pipeline_mode = #tpu.pipeline_mode<synchronous>, transform_indices = @transform_2, window_bounds = array<i64: 40, 32>}, {pipeline_mode = #tpu.pipeline_mode<synchronous>, transform_indices = @transform_3, window_bounds = array<i64: 32, 256>}, {pipeline_mode = #tpu.pipeline_mode<synchronous>, transform_indices = @transform_4, window_bounds = array<i64: 8, 256>}, {pipeline_mode = #tpu.pipeline_mode<synchronous>, transform_indices = @transform_5, window_bounds = array<i64: 1, 256>}, {pipeline_mode = #tpu.pipeline_mode<synchronous>, transform_indices = @transform_6, window_bounds = array<i64: 256, 64>}, {pipeline_mode = #tpu.pipeline_mode<synchronous>, transform_indices = @transform_7, window_bounds = array<i64: 1, 64>}, {transform_indices = @transform_8, window_bounds = array<i64: 8, 64>}]} {
    %c0 = arith.constant 0 : index
    %c0_0 = arith.constant 0 : index
    %0 = vector.load %arg1[%c0, %c0_0] : memref<8x4xi32, #tpu.memory_space<vmem>>, vector<8x4xi32>
    %1 = tpu.iota {dimensions = array<i32: 1>} : vector<8x40xi32>
    %2 = vector.extract_strided_slice %0 {offsets = [0, 0], sizes = [8, 1], strides = [1, 1]} : vector<8x4xi32> to vector<8x1xi32>
    %c0_i32 = arith.constant 0 : i32
    %3 = vector.broadcast %c0_i32 : i32 to vector<8x1xi32>
    %4 = arith.addi %2, %3 : vector<8x1xi32>
    %5 = vector.broadcast %4 : vector<8x1xi32> to vector<8x40xi32>
    %6 = arith.cmpi eq, %1, %5 : vector<8x40xi32>
    %7 = vector.extract_strided_slice %0 {offsets = [0, 1], sizes = [8, 1], strides = [1, 1]} : vector<8x4xi32> to vector<8x1xi32>
    %c10_i32 = arith.constant 10 : i32
    %8 = vector.broadcast %c10_i32 : i32 to vector<8x1xi32>
    %9 = arith.addi %7, %8 : vector<8x1xi32>
    %10 = vector.broadcast %9 : vector<8x1xi32> to vector<8x40xi32>
    %11 = arith.cmpi eq, %1, %10 : vector<8x40xi32>
    %12 = arith.ori %6, %11 : vector<8x40xi1>
    %13 = vector.extract_strided_slice %0 {offsets = [0, 2], sizes = [8, 1], strides = [1, 1]} : vector<8x4xi32> to vector<8x1xi32>
    %c20_i32 = arith.constant 20 : i32
    %14 = vector.broadcast %c20_i32 : i32 to vector<8x1xi32>
    %15 = arith.addi %13, %14 : vector<8x1xi32>
    %16 = vector.broadcast %15 : vector<8x1xi32> to vector<8x40xi32>
    %17 = arith.cmpi eq, %1, %16 : vector<8x40xi32>
    %18 = arith.ori %12, %17 : vector<8x40xi1>
    %19 = vector.extract_strided_slice %0 {offsets = [0, 3], sizes = [8, 1], strides = [1, 1]} : vector<8x4xi32> to vector<8x1xi32>
    %c30_i32 = arith.constant 30 : i32
    %20 = vector.broadcast %c30_i32 : i32 to vector<8x1xi32>
    %21 = arith.addi %19, %20 : vector<8x1xi32>
    %22 = vector.broadcast %21 : vector<8x1xi32> to vector<8x40xi32>
    %23 = arith.cmpi eq, %1, %22 : vector<8x40xi32>
    %24 = arith.ori %18, %23 : vector<8x40xi1>
    %cst = arith.constant 1.000000e+00 : f32
    %cst_1 = arith.constant 0.000000e+00 : f32
    %25 = vector.broadcast %cst : f32 to vector<8x40xf32>
    %26 = vector.broadcast %cst_1 : f32 to vector<8x40xf32>
    %27 = arith.select %24, %25, %26 : vector<8x40xi1>, vector<8x40xf32>
    %28 = arith.truncf %27 : vector<8x40xf32> to vector<8x40xbf16>
    %c0_2 = arith.constant 0 : index
    %c0_3 = arith.constant 0 : index
    %29 = vector.load %arg3[%c0_2, %c0_3] : memref<40x32xbf16, #tpu.memory_space<vmem>>, vector<40x32xbf16>
    %cst_4 = arith.constant dense<0.000000e+00> : vector<8x32xf32>
    %30 = tpu.matmul %28, %29, %cst_4 {dimension_numbers = #tpu.dot_dimension_numbers<[1], [0], [0], [1], [0, 0, 1, 1], [], []>} : vector<8x40xbf16>, vector<40x32xbf16>, vector<8x32xf32> -> vector<8x32xf32>
    %31 = arith.truncf %30 : vector<8x32xf32> to vector<8x32xbf16>
    %c0_5 = arith.constant 0 : index
    %c0_6 = arith.constant 0 : index
    %32 = vector.load %arg4[%c0_5, %c0_6] : memref<32x256xbf16, #tpu.memory_space<vmem>>, vector<32x256xbf16>
    %cst_7 = arith.constant dense<0.000000e+00> : vector<8x256xf32>
    %33 = tpu.matmul %31, %32, %cst_7 {dimension_numbers = #tpu.dot_dimension_numbers<[1], [0], [0], [1], [0, 0, 1, 1], [], []>} : vector<8x32xbf16>, vector<32x256xbf16>, vector<8x256xf32> -> vector<8x256xf32>
    %c0_8 = arith.constant 0 : index
    %c0_9 = arith.constant 0 : index
    %34 = vector.load %arg2[%c0_8, %c0_9] : memref<8x8xbf16, #tpu.memory_space<vmem>>, vector<8x8xbf16>
    %c0_10 = arith.constant 0 : index
    %c0_11 = arith.constant 0 : index
    %35 = vector.load %arg5[%c0_10, %c0_11] : memref<8x256xbf16, #tpu.memory_space<vmem>>, vector<8x256xbf16>
    %cst_12 = arith.constant dense<0.000000e+00> : vector<8x256xf32>
    %36 = tpu.matmul %34, %35, %cst_12 {dimension_numbers = #tpu.dot_dimension_numbers<[1], [0], [0], [1], [0, 0, 1, 1], [], []>} : vector<8x8xbf16>, vector<8x256xbf16>, vector<8x256xf32> -> vector<8x256xf32>
    %37 = arith.addf %33, %36 : vector<8x256xf32>
    %c0_13 = arith.constant 0 : index
    %c0_14 = arith.constant 0 : index
    %38 = vector.load %arg6[%c0_13, %c0_14] : memref<1x256xf32, #tpu.memory_space<vmem>>, vector<1x256xf32>
    %39 = vector.broadcast %38 : vector<1x256xf32> to vector<8x256xf32>
    %40 = arith.addf %37, %39 : vector<8x256xf32>
    %cst_15 = arith.constant 0.000000e+00 : f32
    %41 = vector.broadcast %cst_15 : f32 to vector<8x256xf32>
    %42 = arith.maximumf %40, %41 : vector<8x256xf32>
    %43 = arith.truncf %42 : vector<8x256xf32> to vector<8x256xbf16>
    %c0_16 = arith.constant 0 : index
    %c0_17 = arith.constant 0 : index
    %44 = vector.load %arg7[%c0_16, %c0_17] : memref<256x64xbf16, #tpu.memory_space<vmem>>, vector<256x64xbf16>
    %cst_18 = arith.constant dense<0.000000e+00> : vector<8x64xf32>
    %45 = tpu.matmul %43, %44, %cst_18 {dimension_numbers = #tpu.dot_dimension_numbers<[1], [0], [0], [1], [0, 0, 1, 1], [], []>} : vector<8x256xbf16>, vector<256x64xbf16>, vector<8x64xf32> -> vector<8x64xf32>
    %c0_19 = arith.constant 0 : index
    %c0_20 = arith.constant 0 : index
    %46 = vector.load %arg8[%c0_19, %c0_20] : memref<1x64xf32, #tpu.memory_space<vmem>>, vector<1x64xf32>
    %47 = vector.broadcast %46 : vector<1x64xf32> to vector<8x64xf32>
    %48 = arith.addf %45, %47 : vector<8x64xf32>
    %cst_21 = arith.constant 0.000000e+00 : f32
    %49 = vector.broadcast %cst_21 : f32 to vector<8x64xf32>
    %50 = arith.maximumf %48, %49 : vector<8x64xf32>
    %c0_22 = arith.constant 0 : index
    %c0_23 = arith.constant 0 : index
    %51 = vector.load %arg9[%c0_22, %c0_23] : memref<8x64xf32, #tpu.memory_space<vmem>>, vector<8x64xf32>
    tpu.vector_store %arg9[%c0_22, %c0_23], %50 {strides = array<i32>} : memref<8x64xf32, #tpu.memory_space<vmem>>, vector<8x64xf32>,
    return
  }
  func.func @transform_0(%arg0: i32) -> (i32, i32) {
    %c0_i32 = arith.constant 0 : i32
    %c0_i32_0 = arith.constant 0 : i32
    return %arg0, %c0_i32 : i32, i32
  }
  func.func @transform_1(%arg0: i32) -> (i32, i32) {
    %c0_i32 = arith.constant 0 : i32
    %c0_i32_0 = arith.constant 0 : i32
    return %arg0, %c0_i32 : i32, i32
  }
  func.func @transform_2(%arg0: i32) -> (i32, i32) {
    %c0_i32 = arith.constant 0 : i32
    %c0_i32_0 = arith.constant 0 : i32
    %c0_i32_1 = arith.constant 0 : i32
    return %c0_i32, %c0_i32_0 : i32, i32
  }
  func.func @transform_3(%arg0: i32) -> (i32, i32) {
    %c0_i32 = arith.constant 0 : i32
    %c0_i32_0 = arith.constant 0 : i32
    %c0_i32_1 = arith.constant 0 : i32
    return %c0_i32, %c0_i32_0 : i32, i32
  }
  func.func @transform_4(%arg0: i32) -> (i32, i32) {
    %c0_i32 = arith.constant 0 : i32
    %c0_i32_0 = arith.constant 0 : i32
    %c0_i32_1 = arith.constant 0 : i32
    return %c0_i32, %c0_i32_0 : i32, i32
  }
  func.func @transform_5(%arg0: i32) -> (i32, i32) {
    %c0_i32 = arith.constant 0 : i32
    %c0_i32_0 = arith.constant 0 : i32
    %c0_i32_1 = arith.constant 0 : i32
    return %c0_i32, %c0_i32_0 : i32, i32
  }
  func.func @transform_6(%arg0: i32) -> (i32, i32) {
    %c0_i32 = arith.constant 0 : i32
    %c0_i32_0 = arith.constant 0 : i32
    %c0_i32_1 = arith.constant 0 : i32
    return %c0_i32, %c0_i32_0 : i32, i32
  }
  func.func @transform_7(%arg0: i32) -> (i32, i32) {
    %c0_i32 = arith.constant 0 : i32
    %c0_i32_0 = arith.constant 0 : i32
    %c0_i32_1 = arith.constant 0 : i32
    return %c0_i32, %c0_i32_0 : i32, i32
  }
  func.func @transform_8(%arg0: i32) -> (i32, i32) {
    %c0_i32 = arith.constant 0 : i32
    %c0_i32_0 = arith.constant 0 : i32
    return %arg0, %c0_i32 : i32, i32
  }
}

</mosaic_0001>

<bundles_post_ra>
// kernel: dnnfm_forward.1
= control target key start
LH: loop header
LB: loop body
LE: loop exit
PB: predicated region body
PF: predicated region fallthrough
CT: control target
= control target key end

     0   :  { %v591_v1 = vmov 0   ;;  %v592_v2 = vmov 2   ;;  %vm82_vm0 = vcmask 1043456   ;;  %v593_v6 = vmov 0.0   ;;  %s738_s0 = inlined_call_operand.vmem [shape: s32[8,4], index: 0, kind: input, shape index: {}]   ;;  %s739_s1 = inlined_call_operand.vmem [shape: bf16[8,8], index: 1, kind: input, shape index: {}]   ;;  %s740_s2 = inlined_call_operand.vmem [shape: bf16[40,32], index: 2, kind: input, shape index: {}]   ;;  %s741_s3 = inlined_call_operand.vmem [shape: bf16[32,256], index: 3, kind: input, shape index: {}]   ;;  %s742_s4 = inlined_call_operand.vmem [shape: bf16[8,256], index: 4, kind: input, shape index: {}]   ;;  %s743_s5 = inlined_call_operand.vmem [shape: f32[1,256], index: 5, kind: input, shape index: {}]   ;;  %s744_s6 = inlined_call_operand.vmem [shape: bf16[256,64], index: 6, kind: input, shape index: {}]   ;;  %s745_s7 = inlined_call_operand.vmem [shape: f32[1,64], index: 7, kind: input, shape index: {}]   ;;  %s746_s8 = inlined_call_operand.hbm [shape: f32[8,64], index: 8, kind: output, shape index: {}]  }
   0x1   :  { %v31_v0 = vld [vmem:[%s738_s0] sm:$0xff]  ;;  %537 = vset.pattern.permute.xlu0 %v591_v1  ;;  %539 = vset.pattern.permute.xlu1 %v592_v2  ;;  %v542_v4 = vld [vmem:[%s740_s2 + $0x10] ss:$0 sps:$4 sm:$0xff]   ;;  %v543_v9 = vld [vmem:[%s740_s2 + $0x8] sm:$0xff]   ;;  %v594_v10 = vmov 1   ;;  %v595_v11 = vmov 3  }
   0x2   :  { %v44_v3 = vadd.s32 20, %v31_v0  ;;  %35 = vperm.xlu0 %537, %v31_v0   ;;  %v38_v5 = vadd.s32 10, %v31_v0  ;;  %520 = vmatprep.subr.bf16.mxu1 %v593_v6  ;;  %v50_v7 = vadd.s32 30, %v31_v0  ;;  %v84_v8 = vsel %vm82_vm0, %v542_v4, 0  ;;  %v544_v12 = vld [vmem:[%s740_s2] sm:$0xff]  }
   0x3   :  { %521 = vmatpush3.bf16.msra.mxu1 %v84_v8  ;;  %vm596_vm1 = vmmov 0   ;;  %v132_v13 = vld [vmem:[%s742_s4] sm:$0xff] }
   0x4   :  { %46 = vperm.xlu1 %539, %v44_v3   ;;  %522 = vmatprep.subr.bf16.mxu1 %v593_v6  ;;  %v469_v14 = vcombine.high %v132_v13, %v132_v13  ;;  %v468_v15 = vcombine.low %v132_v13, %v132_v13 }
   0x5   :  { %526 = vmatprep.mubr.msk.bf16.mxu1 %vm596_vm1, %v593_v6 }
   0x6   :  { %538 = vset.pattern.permute.xlu0 %v594_v10  ;;  %v143_v16 = vsel %vm82_vm0, %v468_v15, 0 }
   0x7   :  { %40 = vperm.xlu0 %538, %v38_v5   ;;  %523 = vmatpush3.bf16.msra.mxu1 %v543_v9 }
   0x8   :  { %540 = vset.pattern.permute.xlu1 %v595_v11  ;;  %524 = vmatprep.subr.bf16.mxu1 %v593_v6 }
   0x9   :  { %52 = vperm.xlu1 %540, %v50_v7  }
   0xb   :  { %541 = vset.pattern.permute.xlu0 %v595_v11  ;;  %525 = vmatpush3.bf16.msra.mxu1 %v544_v12 }
   0xc   :  { %470 = vmatprep.subr.msk.bf16.mxu1 %vm82_vm0, %v469_v14 }
   0xd   :  { %13 = vsyncpa [#allocation3], 0  ;;  %v32_v17 = vlaneseq  ;;  %vm78_vm9 = vcmask 326656   ;;  %v549_v25 = vld [vmem:[%s741_s3 + $0x14] ss:$8 sps:$4 sm:$0xff]   ;;  %vm138_vm10 = vcmask 64512  }
   0xe   :  { %v131_v26 = vld [vmem:[%s739_s1] sm:$0xf]  ;;  %v547_v27 = vld [vmem:[%s741_s3 + $0x10] ss:$8 sps:$4 sm:$0xff]   ;;  %v552_v28 = vld [vmem:[%s741_s3 + $0x4] ss:$8 sps:$4 sm:$0xff]  }
   0xf   :  { %v33_v20 = vand.u32 127, %v32_v17  ;;  %v550_v29 = vld [vmem:[%s741_s3] ss:$8 sps:$4 sm:$0xff]   ;;  %v553_v30 = vld [vmem:[%s744_s6 + $0x78] sm:$0xff]   ;;  %v555_v32 = vld [vmem:[%s744_s6 + $0x70] sm:$0xff]   ;;  %vm209_vm11 = vcmask 261120  }
  0x10   :  { %v554_v31 = vld [vmem:[%s744_s6 + $0x38] sm:$0xff]   ;;  %498 = vmatprep.subr.bf16.mxu0 %v553_v30  ;;  %v556_v33 = vld [vmem:[%s744_s6 + $0x30] sm:$0xff]   ;;  %v557_v34 = vld [vmem:[%s744_s6 + $0x68] sm:$0xff]   ;;  %v257_v55 = vshrl.u32 %v32_v17, 7  ;;  %s597_s3 = smov [#allocation2]   ;;  %vm448_vm12 = vcmask 523264  }
  0x11   :  { %499 = vmatpush3.bf16.msra.mxu0 %v554_v31  ;;  %v558_v35 = vld [vmem:[%s744_s6 + $0x28] sm:$0xff]   ;;  %v559_v36 = vld [vmem:[%s744_s6 + $0x60] sm:$0xff]   ;;  %v561_v38 = vld [vmem:[%s744_s6 + $0x58] sm:$0xff]   ;;  %s456_s28 = sshll.u32 %s597_s3, 4  ;;  %s457_s28 = int_to_ptr.vmem [resolvable:$true] %s456_s28 }
  0x12   :  { %500 = vmatprep.subr.bf16.mxu0 %v555_v32  ;;  %v560_v37 = vld [vmem:[%s744_s6 + $0x20] sm:$0xff]   ;;  %v562_v39 = vld [vmem:[%s744_s6 + $0x18] sm:$0xff]   ;;  %v563_v49 = vld [vmem:[%s744_s6 + $0x50] sm:$0xff]   ;;  %v258_v56 = vsub.s32 0, %v257_v55  ;;  %v262_v58 = vsub.s32 1, %v257_v55  ;;  %s569_s29 = scalar_lea.vmem %s457_s28, 128  ;;  %p574_p1 = scmp.lt.s32.totalorder %s457_s28, %s457_s28 }
  0x13   :  { %v564_v50 = vld [vmem:[%s744_s6 + $0x10] sm:$0xff]   ;;  %v565_v51 = vld [vmem:[%s744_s6 + $0x48] sm:$0xff]   ;;  %v567_v53 = vld [vmem:[%s744_s6 + $0x40] sm:$0xff]   ;;  %p570_p0 = scmp.ne.s32.totalorder %s457_s28, %s569_s29  ;;  %p575_p2 = scmp.lt.s32.totalorder %s569_s29, %s569_s29 }
  0x14   :  { %v566_v52 = vld [vmem:[%s744_s6 + $0x8] sm:$0xff]   ;;  %v568_v54 = vld [vmem:[%s744_s6] sm:$0xff]  }
  0x15   :  { %501 = vmatpush3.bf16.msra.mxu0 %v556_v33  ;;  %v254_v57 = vld [vmem:[%s743_s5] sm:$0x3]  ;;  %p576_p3 = por %p575_p2, %p574_p1 }
  0x16   :  { %502 = vmatprep.subr.bf16.mxu0 %v557_v34  ;;  %v259_v59 = vrot.slane %v254_v57, %v258_v56  ;;  %v263_v62 = vrot.slane %v254_v57, %v262_v58  ;;  %v477_v10 = vld [vmem:[%s745_s7] ss:$0 sm:$0xff] }
  0x17   :  { %p577_p4 = pnand %p576_p3, %p570_p0 }
  0x19   :  { %503 = vmatpush3.bf16.msra.mxu0 %v558_v35 }
  0x1a   :  { %504 = vmatprep.subr.bf16.mxu0 %v559_v36 }
  0x1d   :  { %505 = vmatpush3.bf16.msra.mxu0 %v560_v37 }
  0x1e   :  { %506 = vmatprep.subr.bf16.mxu0 %v561_v38 }
  0x21   :  { %507 = vmatpush3.bf16.msra.mxu0 %v562_v39 }
  0x22   :  { %508 = vmatprep.subr.bf16.mxu0 %v563_v49 }
  0x25   :  { %509 = vmatpush3.bf16.msra.mxu0 %v564_v50 }
  0x26   :  { %510 = vmatprep.subr.bf16.mxu0 %v565_v51 }
  0x29   :  { %511 = vmatpush3.bf16.msra.mxu0 %v566_v52 }
  0x2a   :  { %512 = vmatprep.subr.bf16.mxu0 %v567_v53 }
  0x2d   :  { %513 = vmatpush3.bf16.msra.mxu0 %v568_v54 }
  0x7d   :  { %v36_v18 = vpop.permute.xlu0 %35 }
  0x7e   :  { %vm37_vm2 = vcmp.eq.s32.totalorder %v33_v20, %v36_v18 }
  0x7f   :  { %v47_v19 = vpop.permute.xlu1 %46 }
  0x80   :  { %vm48_vm4 = vcmp.eq.s32.totalorder %v33_v20, %v47_v19 }
  0x82   :  { %v41_v21 = vpop.permute.xlu0 %40 }
  0x83   :  { %vm42_vm3 = vcmp.eq.s32.totalorder %v33_v20, %v41_v21 }
  0x84   :  { %v53_v22 = vpop.permute.xlu1 %52  ;;  %vm43_vm5 = vmor %vm37_vm2, %vm42_vm3 }
  0x85   :  { %vm54_vm6 = vcmp.eq.s32.totalorder %v33_v20, %v53_v22  ;;  %vm49_vm7 = vmor %vm43_vm5, %vm48_vm4 }
  0x86   :  { %vm55_vm8 = vmor %vm49_vm7, %vm54_vm6 }
  0x87   :  { %v56_v23 = vsel %vm55_vm8, 1.0, %v593_v6 }
  0x88   :  { %v57_v24 = vpack.c.bf16 %v56_v23, %v56_v23 }
  0x8a   :  { %527 = vmatmul.mubr.msk.bf16.vlgmr.msra.gmra.mxu1 %vm78_vm9, %v57_v24 }
  0x8b   :  { %163 = vmatpush1.bf16.msra.mxu1 %v143_v16  ;;  %180 = vmatprep.mubr.bf16.mxu1 %v591_v1 }
  0x8c   :  { %225 = vmatprep.subr.bf16.mxu1 %v549_v25 }
  0x92   :  { %471 = vmatmul.mubr.msk.bf16.vlgmr.msra.gmra.mxu1 %vm138_vm10, %v131_v26 }
  0x93   :  { %226 = vmatpush1.bf16.msra.mxu1 %v547_v27  ;;  %245 = vmatprep.mubr.bf16.mxu1 %v591_v1 }
  0x94   :  { %227 = vmatprep.subr.bf16.mxu1 %v552_v28 }
  0x97   :  { %228 = vmatpush1.bf16.msra.mxu1 %v550_v29 }
 0x14a   :  { %v120_v40 = vpop.f32.mrf.mxu1 }
 0x14b   :  { %v126_v41 = vpack.c.bf16 %v120_v40, %v120_v40 }
 0x14c   :  { %v528_v42 = vpop.f32.mrf.mxu1 }
 0x14d   :  { %476 = vmatmul.mubr.msk.bf16.vlgmr.msra.gmra.mxu1 %vm209_vm11, %v126_v41 }
 0x14e   :  { %v123_v43 = vpop.f32.mrf.mxu1 }
 0x150   :  { %v529_v44 = vpop.f32.mrf.mxu1 }
 0x152   :  { %v182_v45 = vpop.f32.mrf.mxu1 }
 0x154   :  { %v184_v46 = vpop.f32.mrf.mxu1 }
 0x156   :  { %v186_v47 = vpop.f32.mrf.mxu1 }
 0x158   :  { %v187_v48 = vpop.f32.mrf.mxu1 }
 0x20d   :  { %v247_v60 = vpop.f32.mrf.mxu1 }
 0x20e   :  { %v248_v61 = vadd.f32 %v247_v60, %v182_v45 }
 0x20f   :  { %v249_v63 = vpop.f32.mrf.mxu1 }
 0x210   :  { %v266_v0 = vadd.f32 %v259_v59, %v248_v61  ;;  %v250_v1 = vadd.f32 %v249_v63, %v184_v46 }
 0x211   :  { %v251_v2 = vpop.f32.mrf.mxu1 }
 0x212   :  { %v267_v3 = vadd.f32 %v263_v62, %v250_v1  ;;  %v268_v4 = vmax.f32 %v266_v0, 0.0 }
 0x213   :  { %v252_v5 = vpop.f32.mrf.mxu1 }
 0x214   :  { %v269_v6 = vmax.f32 %v267_v3, 0.0  ;;  %v270_v8 = vpack.c.bf16 %v268_v4, %v268_v4 }
 0x216   :  { %v271_v7 = vpack.c.bf16 %v269_v6, %v269_v6 }
 0x218   :  { %439 = vmatprep.mubr.bf16.mxu0 %v271_v7 }
 0x219   :  { %440 = vmatmul.mubr.bf16.vlgmr.msra.gmra.mxu0 %v270_v8 }
 0x2d9   :  { %v514_v9 = vpop.f32.mrf.mxu0 }
 0x2db   :  { %v515_v11 = vpop.f32.mrf.mxu0 }
 0x2dc   :  { %v516_v12 = vadd.f32 %v515_v11, %v514_v9 }
 0x2dd   :  { %v517_v13 = vpop.f32.mrf.mxu0 }
 0x2de   :  { %v442_v14 = vadd.f32 %v516_v12, %v477_v10 }
 0x2df   :  { %v518_v15 = vpop.f32.mrf.mxu0 }
 0x2e0   :  { %v447_v16 = vmax.f32 %v442_v14, 0.0 }
 0x2e2   :  { %449 = vst.msk [vmem:[#allocation2] sm:$0xff] %vm448_vm12, %v447_v16 }
 0x2e3   :  { %580 = shalt.err (!%p577_p4)
}
 0x2e4   :  { %459 = dma.vmem_to_hbm [thread:$0]  %s457_s28, 128, %s746_s8, [#allocation3]  }
 0x2e5   :  { %589 = dma.done.wait [#allocation3], 128  }
 0x2e6   :  { %590 = vsyncadd [#allocation3], 4294967168 }
 0x2e7   :  { %463 = vsyncpa [#allocation3], 1 }

</bundles_post_ra>
